<compile_context>
chip_gen: v7x
topology: tpu7x:2x2x1
jax: 0.10.0
libtpu: 0.0.40
codegen_flags: <defaults>
</compile_context>

<pallas_src>
import jax
import jax.numpy as jnp
from jax.experimental import pallas as pl
from jax.experimental.pallas import tpu as pltpu


def _round_up(x, m):
    return ((x + m - 1) // m) * m


def _cdiv(a, b):
    return -(-a // b)


def attn_general_kernel(h_ref, e_ref, o_ref):
    # h_ref: (TB, H), e_ref: (TB, S, H), o_ref: (TB, S)
    h = h_ref[...].astype(jnp.float32)                 # (TB, H)
    e = e_ref[...].astype(jnp.float32)                 # (TB, S, H)
    # energy[b, s] = <hidden[b], encoder_outputs[b, s]>
    # VPU broadcast multiply + XLU lane reduce over H (no MXU, no transpose).
    s = jnp.sum(e * h[:, None, :], axis=-1)            # (TB, S) f32
    # numerically stable softmax over the sequence axis (dim=2 in PyTorch)
    m = jnp.max(s, axis=-1, keepdims=True)
    p = jnp.exp(s - m)
    denom = jnp.sum(p, axis=-1, keepdims=True)
    o_ref[...] = (p / denom).astype(o_ref.dtype)       # exact divide: free (DMA-bound)


def _choose_tb(B, S, H, itemsize):
    """Pick the batch tile TB.

    TB must be a multiple of 8 (sublane rule for the (TB, H)/(TB, S) blocks)
    unless it equals the full batch B. It is sized so the double-buffered
    encoder stream stays within ~24 MiB of VMEM (safe for v7x's 64 MiB), and
    split so the grid has >= 2 steps whenever B > 8 so both v7x TensorCores
    get work (neutral on single-TC v5e/v6e).
    """
    budget = 24 * 1024 * 1024
    row_bytes = max(1, S * H * itemsize)
    tb_cap = max(1, budget // (2 * row_bytes))
    if B <= 8:
        return B                                  # single block; TB == B is legal
    tb_cap = min(tb_cap, _cdiv(B, 2))             # keep grid >= 2 (two v7x TCs)
    tb_cap = max(tb_cap, 8)                       # minimum legal sublane tile
    n_blocks = _cdiv(B, tb_cap)
    tb = _round_up(_cdiv(B, n_blocks), 8)         # balanced blocks, minimal tail waste
    return min(tb, B)


def _vmem_limit_bytes(TB, S, H, itemsize):
    # 2x e buffers + small h/out buffers + compiler scratch headroom,
    # capped well under v7x's 64 MiB per-TC VMEM.
    e_stream = 2 * TB * S * H * itemsize
    return min(56 * 1024 * 1024, max(48 * 1024 * 1024, e_stream + 8 * 1024 * 1024))


def attn_forward(hidden, encoder_outputs):
    # hidden: (1, B, H), encoder_outputs: (B, S, H)
    _, B, H = hidden.shape
    Be, S, He = encoder_outputs.shape
    assert Be == B and He == H

    dtype = hidden.dtype
    itemsize = jnp.dtype(dtype).itemsize

    TB = _choose_tb(B, S, H, itemsize)
    grid = pl.cdiv(B, TB)

    h2 = hidden.reshape(B, H)                      # free squeeze of the leading 1

    cost = pl.CostEstimate(
        flops=2 * B * S * H,
        transcendentals=B * S,
        bytes_accessed=(B * S * H + B * H + B * S) * itemsize,
    )

    out = pl.pallas_call(
        attn_general_kernel,
        out_shape=jax.ShapeDtypeStruct((B, S), dtype),
        grid_spec=pltpu.PrefetchScalarGridSpec(
            num_scalar_prefetch=0,
            grid=(grid,),
            in_specs=[
                pl.BlockSpec((TB, H), lambda b: (b, 0)),
                pl.BlockSpec((TB, S, H), lambda b: (b, 0, 0)),
            ],
            out_specs=pl.BlockSpec((TB, S), lambda b: (b, 0)),
        ),
        compiler_params=pltpu.CompilerParams(
            dimension_semantics=("parallel",),
            vmem_limit_bytes=_vmem_limit_bytes(TB, S, H, itemsize),
        ),
        cost_estimate=cost,
    )(h2, encoder_outputs)

    # F.softmax(...).unsqueeze(0).unsqueeze(0) -> (1, 1, B, 1, S)
    return out.reshape(1, 1, B, 1, S)


class AttnParams:
    """Deterministic params mirroring Attn('general', H).__init__ (unused in forward)."""

    def __init__(self, hidden_size, key):
        k1, k2 = jax.random.split(key)
        bound = 1.0 / (hidden_size ** 0.5)
        self.attn_weight = jax.random.uniform(
            k1, (hidden_size, hidden_size), jnp.float32, -bound, bound)
        self.attn_bias = jax.random.uniform(
            k2, (hidden_size,), jnp.float32, -bound, bound)


if __name__ == "__main__":
    B, S, H = 2, 8, 32
    key = jax.random.PRNGKey(0)
    k_h, k_e, k_p = jax.random.split(key, 3)

    _params = AttnParams(H, k_p)  # created for shape parity; not used (as in PyTorch)

    hidden = jax.random.normal(k_h, (1, B, H), jnp.float32)
    encoder_outputs = jax.random.normal(k_e, (B, S, H), jnp.float32)

    out = attn_forward(hidden, encoder_outputs)
    out = jax.block_until_ready(out)

    # plain-JAX reference of the PyTorch forward
    ref = jax.nn.softmax(
        jnp.einsum('bqh,bsh->bqs',
                   jnp.transpose(hidden, (1, 0, 2)), encoder_outputs),
        axis=-1).reshape(1, 1, B, 1, S)

    assert out.shape == (1, 1, B, 1, S)
    assert jnp.allclose(out, ref, atol=1e-5, rtol=1e-5)
    print("KERNEL_OK")
</pallas_src>

<mosaic_0001>
module attributes {stable_mosaic.version = 11 : i64} {
  func.func @attn_general_kernel(%arg0: i32, %arg1: memref<2x32xf32, #tpu.memory_space<vmem>>, %arg2: memref<2x8x32xf32, #tpu.memory_space<vmem>>, %arg3: memref<2x8xf32, #tpu.memory_space<vmem>>) attributes {dimension_semantics = [#tpu.dimension_semantics<parallel>], iteration_bounds = array<i64: 1>, scalar_prefetch = 0 : i64, scratch_operands = 0 : i64, tpu.core_type = #tpu.core_type<tc>, window_params = [{transform_indices = @transform_0, window_bounds = array<i64: 2, 32>}, {transform_indices = @transform_1, window_bounds = array<i64: 2, 8, 32>}, {transform_indices = @transform_2, window_bounds = array<i64: 2, 8>}]} {
    %c0 = arith.constant 0 : index
    %c0_0 = arith.constant 0 : index
    %0 = vector.load %arg1[%c0, %c0_0] : memref<2x32xf32, #tpu.memory_space<vmem>>, vector<2x32xf32>
    %c0_1 = arith.constant 0 : index
    %c0_2 = arith.constant 0 : index
    %c0_3 = arith.constant 0 : index
    %1 = vector.load %arg2[%c0_1, %c0_2, %c0_3] : memref<2x8x32xf32, #tpu.memory_space<vmem>>, vector<2x8x32xf32>
    %2 = vector.shape_cast %0 : vector<2x32xf32> to vector<2x1x32xf32>
    %3 = vector.broadcast %2 : vector<2x1x32xf32> to vector<2x8x32xf32>
    %4 = arith.mulf %1, %3 : vector<2x8x32xf32>
    %cst = arith.constant dense<0.000000e+00> : vector<2x8xf32>
    %5 = vector.multi_reduction <add>, %4, %cst [2] : vector<2x8x32xf32> to vector<2x8xf32>
    %cst_4 = arith.constant dense<0xFF800000> : vector<2xf32>
    %6 = vector.multi_reduction <maximumf>, %5, %cst_4 [1] : vector<2x8xf32> to vector<2xf32>
    %7 = vector.shape_cast %6 : vector<2xf32> to vector<2x1xf32>
    %8 = vector.broadcast %7 : vector<2x1xf32> to vector<2x8xf32>
    %9 = arith.subf %5, %8 : vector<2x8xf32>
    %10 = math.exp %9 : vector<2x8xf32>
    %cst_5 = arith.constant dense<0.000000e+00> : vector<2xf32>
    %11 = vector.multi_reduction <add>, %10, %cst_5 [1] : vector<2x8xf32> to vector<2xf32>
    %12 = vector.shape_cast %11 : vector<2xf32> to vector<2x1xf32>
    %13 = vector.broadcast %12 : vector<2x1xf32> to vector<2x8xf32>
    %14 = arith.divf %10, %13 : vector<2x8xf32>
    %c0_6 = arith.constant 0 : index
    %c0_7 = arith.constant 0 : index
    %15 = vector.load %arg3[%c0_6, %c0_7] : memref<2x8xf32, #tpu.memory_space<vmem>>, vector<2x8xf32>
    tpu.vector_store %arg3[%c0_6, %c0_7], %14 {strides = array<i32>} : memref<2x8xf32, #tpu.memory_space<vmem>>, vector<2x8xf32>,
    return
  }
  func.func @transform_0(%arg0: i32) -> (i32, i32) {
    %c0_i32 = arith.constant 0 : i32
    %c0_i32_0 = arith.constant 0 : i32
    return %arg0, %c0_i32 : i32, i32
  }
  func.func @transform_1(%arg0: i32) -> (i32, i32, i32) {
    %c0_i32 = arith.constant 0 : i32
    %c0_i32_0 = arith.constant 0 : i32
    %c0_i32_1 = arith.constant 0 : i32
    return %arg0, %c0_i32, %c0_i32_0 : i32, i32, i32
  }
  func.func @transform_2(%arg0: i32) -> (i32, i32) {
    %c0_i32 = arith.constant 0 : i32
    %c0_i32_0 = arith.constant 0 : i32
    return %arg0, %c0_i32 : i32, i32
  }
}

</mosaic_0001>

<bundles_post_ra>
// kernel: tpu_custom_call.1
= control target key start
LH: loop header
LB: loop body
LE: loop exit
PB: predicated region body
PF: predicated region fallthrough
CT: control target
= control target key end

     0   :  { %7 = vsyncpa [#allocation3], 0  ;;  %s359_s0 = inlined_call_operand.hbm [shape: f32[2,32], index: 0, kind: input, shape index: {}]   ;;  %s360_s1 = inlined_call_operand.hbm [shape: f32[2,8,32], index: 1, kind: input, shape index: {}]   ;;  %s361_s2 = inlined_call_operand.hbm [shape: f32[2,8], index: 2, kind: output, shape index: {}]  }
   0x1   :  { %8 = vsyncpa [#allocation6], 0 }
   0x2   :  { %9 = vsyncpa [#allocation4], 0  ;;  %s280_s9 = smov [#allocation2]   ;;  %s281_s11 = smov [#allocation5]  }
   0x3   :  { %s16_s10 = sshll.u32 %s280_s9, 4  ;;  %s25_s12 = sshll.u32 %s281_s11, 4  ;;  %s17_s10 = int_to_ptr.vmem [resolvable:$true] %s16_s10  ;;  %s302_s12 = int_to_ptr.vmem [resolvable:$true] %s25_s12 }
   0x4   :  { %s208_s15 = scalar_lea.hbm %s359_s0, 32 }
   0x5   :  { %p209_p0 = scmp.ne.s32.totalorder %s359_s0, %s208_s15  ;;  %p212_p1 = scmp.lt.u32.totalorder %s208_s15, %s359_s0 }
   0x7   :  { %p214_p2 = pnand %p212_p1, %p209_p0 }
   0x9   :  { %217 = shalt.err (!%p214_p2)
}
   0xa   :  { %s218_s20 = scalar_lea.vmem %s17_s10, 32  ;;  %p223_p4 = scmp.lt.s32.totalorder %s17_s10, %s17_s10 }
   0xb   :  { %p219_p3 = scmp.ne.s32.totalorder %s17_s10, %s218_s20  ;;  %p224_p5 = scmp.lt.s32.totalorder %s218_s20, %s218_s20 }
   0xd   :  { %p225_p6 = por %p224_p5, %p223_p4 }
   0xf   :  { %p226_p7 = pnand %p225_p6, %p219_p3 }
  0x11   :  { %229 = shalt.err (!%p226_p7)
}
  0x12   :  { %19 = dma.hbm_to_vmem [thread:$0]  %s359_s0, 32, %s17_s10, [#allocation3]  }
  0x13   :  { %s230_s25 = scalar_lea.hbm %s360_s1, 256 }
  0x14   :  { %p231_p8 = scmp.ne.s32.totalorder %s360_s1, %s230_s25  ;;  %p234_p9 = scmp.lt.u32.totalorder %s230_s25, %s360_s1 }
  0x16   :  { %p236_p10 = pnand %p234_p9, %p231_p8 }
  0x18   :  { %239 = shalt.err (!%p236_p10)
}
  0x19   :  { %s240_s30 = scalar_lea.vmem %s302_s12, 256  ;;  %p245_p12 = scmp.lt.s32.totalorder %s302_s12, %s302_s12 }
  0x1a   :  { %p241_p11 = scmp.ne.s32.totalorder %s302_s12, %s240_s30  ;;  %p246_p13 = scmp.lt.s32.totalorder %s240_s30, %s240_s30 }
  0x1c   :  { %p247_p0 = por %p246_p13, %p245_p12 }
  0x1e   :  { %p248_p1 = pnand %p247_p0, %p241_p11 }
  0x20   :  { %251 = shalt.err (!%p248_p1)
}
  0x21   :  { %s282_s0 = smov 128   ;;  %s283_s3 = smov 8  }
  0x22   :  { %31 = dma.hbm_to_vmem [thread:$0]  %s360_s1, 256, %s302_s12, [#allocation6], %s282_s0, %s282_s0, %s283_s3  }
  0x23   :  { %274 = dma.done.wait [#allocation3], 32  }
  0x24   :  { %275 = vsyncadd [#allocation3], 4294967264 }
  0x25   :  { %276 = dma.done.wait [#allocation6], 256  }
  0x26   :  { %277 = vsyncadd [#allocation6], 4294967040  ;;  %v53_v0 = vlaneseq  ;;  %v284_v1 = vmov 1966171168   ;;  %v39_v12 = vld [vmem:[#allocation5] sm:$0xff]  ;;  %vm76_vm0 = vcmask 261120  }
  0x27   :  { %v51_v2 = vunpack.c.l.s4 %v284_v1  ;;  %v190_v9 = vld.sshfl [vmem:[#allocation2] sm:$0x11 pattern:$0x75316420]  ;;  %v40_v15 = vld [vmem:[#allocation5 + $0x8] sm:$0xff]  ;;  %vm95_vm1 = vcmask 1041409  }
  0x28   :  { %v54_v3 = vshrl.u32 %v53_v0, 7  ;;  %v86_v4 = vand.u32 127, %v53_v0  ;;  %v49_v11 = vcombine.high %v190_v9, %v190_v9  ;;  %vm98_vm2 = vcmask 58368   ;;  %s286_s1 = smov [#allocation7]  }
  0x29   :  { %v52_v5 = vunpack.c.0.s8 %v51_v2  ;;  %v285_v27 = vmov 0   ;;  %s180_s6 = sshll.u32 %s286_s1, 4  ;;  %s181_s6 = int_to_ptr.vmem [resolvable:$true] %s180_s6 }
  0x2a   :  { %v333_v6 = vsub.s32 %v86_v4, %v54_v3  ;;  %v66_v8 = vsub.s32 0, %v54_v3  ;;  %199 = vset.pattern.permute.xlu0 %v285_v27  ;;  %198 = vset.pattern.permute.xlu1 %v285_v27  ;;  %v109_v28 = vsub.s32 1, %v54_v3  ;;  %s252_s7 = scalar_lea.vmem %s181_s6, 32  ;;  %p257_p3 = scmp.lt.s32.totalorder %s181_s6, %s181_s6 }
  0x2b   :  { %v55_v7 = vsub.s32 %v52_v5, %v54_v3  ;;  %p253_p2 = scmp.ne.s32.totalorder %s181_s6, %s252_s7  ;;  %p258_p4 = scmp.lt.s32.totalorder %s252_s7, %s252_s7 }
  0x2d   :  { %v56_v10 = vrot.slane %v190_v9, %v55_v7  ;;  %v63_v14 = vrot.slane %v49_v11, %v55_v7  ;;  %p259_p5 = por %p258_p4, %p257_p3 }
  0x2f   :  { %v67_v13 = vrot.slane %v56_v10, %v66_v8  ;;  %v71_v17 = vrot.slane %v63_v14, %v66_v8  ;;  %p260_p6 = pnand %p259_p5, %p253_p2 }
  0x31   :  { %v74_v16 = vmul.f32 %v67_v13, %v39_v12  ;;  %v75_v19 = vmul.f32 %v71_v17, %v40_v15 }
  0x33   :  { %v77_v18 = vsel %vm76_vm0, %v74_v16, 0.0  ;;  %v80_v20 = vsel %vm76_vm0, %v75_v19, 0.0 }
  0x34   :  { %78 = vadd.xlane.f32.xlu0 %v77_v18 }
  0x38   :  { %81 = vadd.xlane.f32.xlu0 %v80_v20 }
  0xc1   :  { %v79_v21 = vpop.xlane.xlu0 %78 }
  0xc2   :  { %v90_v23 = vrot.slane %v79_v21, %v333_v6 }
  0xc5   :  { %v82_v22 = vpop.xlane.xlu0 %81 }
  0xc6   :  { %v94_v24 = vrot.slane %v82_v22, %v333_v6 }
  0xc8   :  { %v96_v25 = vsel %vm95_vm1, %v94_v24, %v90_v23 }
  0xc9   :  { %v99_v26 = vsel %vm98_vm2, %v96_v25, -inf }
  0xca   :  { %100 = vmax.xlane.f32.xlu1 %v99_v26 }
 0x157   :  { %v101_v29 = vpop.xlane.xlu1 %100 }
 0x158   :  { %v106_v30 = vrot.slane %v101_v29, %v66_v8  ;;  %v110_v31 = vrot.slane %v101_v29, %v109_v28 }
 0x15a   :  { %v113_v32 = vsub.f32 %v79_v21, %v106_v30  ;;  %v114_v33 = vsub.f32 %v82_v22, %v110_v31 }
 0x15c   :  { %v115_v34 = vmul.f32 1.442695, %v113_v32  ;;  %v117_v35 = vmul.f32 1.442695, %v114_v33 }
 0x15e   :  { %200 = vpow2.f32 %v115_v34 }
 0x15f   :  { %202 = vpow2.f32 %v117_v35 }
 0x168   :  { %v201_v36 = vpop.eup %200 }
 0x169   :  { %v203_v37 = vpop.eup %202  ;;  %122 = vperm.xlu1 %198, %v201_v36  }
 0x16a   :  { %125 = vperm.xlu0 %199, %v203_v37  }
 0x1e8   :  { %v123_v38 = vpop.permute.xlu1 %122 }
 0x1e9   :  { %v126_v39 = vpop.permute.xlu0 %125  ;;  %v130_v40 = vrot.slane %v123_v38, %v333_v6 }
 0x1ea   :  { %v134_v41 = vrot.slane %v126_v39, %v333_v6 }
 0x1ec   :  { %v135_v42 = vsel %vm95_vm1, %v134_v41, %v130_v40 }
 0x1ed   :  { %v137_v43 = vsel %vm98_vm2, %v135_v42, 0.0 }
 0x1ee   :  { %138 = vadd.xlane.f32.xlu1 %v137_v43 }
 0x27b   :  { %v139_v44 = vpop.xlane.xlu1 %138 }
 0x27c   :  { %v144_v45 = vrot.slane %v139_v44, %v66_v8  ;;  %v148_v46 = vrot.slane %v139_v44, %v109_v28 }
 0x27e   :  { %204 = vrcp.f32 %v144_v45 }
 0x27f   :  { %206 = vrcp.f32 %v148_v46 }
 0x288   :  { %v205_v47 = vpop.eup %204 }
 0x289   :  { %v152_v48 = vmul.f32 %v205_v47, %v201_v36  ;;  %v207_v49 = vpop.eup %206 }
 0x28a   :  { %v154_v50 = vmul.f32 %v207_v49, %v203_v37 }
 0x28b   :  { %158 = vperm.xlu0 %199, %v152_v48  }
 0x28f   :  { %161 = vperm.xlu0 %199, %v154_v50  }
 0x30a   :  { %v159_v51 = vpop.permute.xlu0 %158 }
 0x30b   :  { %v166_v53 = vrot.slane %v159_v51, %v333_v6 }
 0x30e   :  { %v162_v52 = vpop.permute.xlu0 %161 }
 0x30f   :  { %v170_v54 = vrot.slane %v162_v52, %v333_v6 }
 0x311   :  { %v171_v55 = vsel %vm95_vm1, %v170_v54, %v166_v53 }
 0x312   :  { %173 = vst.msk [vmem:[#allocation7] sm:$0x3] %vm98_vm2, %v171_v55 }
 0x313   :  { %263 = shalt.err (!%p260_p6)
}
 0x314   :  { %s264_s10 = scalar_lea.hbm %s361_s2, 32 }
 0x315   :  { %p265_p7 = scmp.ne.s32.totalorder %s361_s2, %s264_s10  ;;  %p268_p8 = scmp.lt.u32.totalorder %s264_s10, %s361_s2 }
 0x317   :  { %p270_p9 = pnand %p268_p8, %p265_p7 }
 0x319   :  { %273 = shalt.err (!%p270_p9)
}
 0x31a   :  { %183 = dma.vmem_to_hbm [thread:$0]  %s181_s6, 32, %s361_s2, [#allocation4]  }
 0x31b   :  { %278 = dma.done.wait [#allocation4], 32  }
 0x31c   :  { %279 = vsyncadd [#allocation4], 4294967264 }
 0x31d   :  { %187 = vsyncpa [#allocation3], 1 }
 0x31e   :  { %188 = vsyncpa [#allocation6], 1 }
 0x31f   :  { %189 = vsyncpa [#allocation4], 1 }

</bundles_post_ra>
